<compile_context>
chip_gen: v6e
topology: v6e:2x2x1
jax: 0.10.0
libtpu: 0.0.40
codegen_flags: <defaults>
</compile_context>

<pallas_src>
import jax
import jax.numpy as jnp
from jax.experimental import pallas as pl
from jax.experimental.pallas import tpu as pltpu


# --------------------------------------------------------------------------- helpers

def _round_up(x: int, m: int) -> int:
    return ((x + m - 1) // m) * m


def _sublane_quantum(dtype) -> int:
    """Sublane packing quantum: 8 for f32, 16 for bf16/f16, 32 for 8-bit dtypes."""
    isz = jnp.dtype(dtype).itemsize
    return max(8, 32 // max(isz, 1))


def _tpu_config():
    """Best-effort (vmem_capacity_bytes, tensorcores_per_chip, generation_tag)."""
    vmem_cap = 128 * 1024 * 1024
    num_tc = 1
    gen = "v6e"
    try:
        kind = jax.devices()[0].device_kind.lower()
    except Exception:
        kind = ""
    if "v7" in kind:
        gen, vmem_cap, num_tc = "v7x", 64 * 1024 * 1024, 2
    elif "v6" in kind:
        gen = "v6e"
    elif "v5" in kind:
        gen = "v5e"
    try:
        info = pltpu.get_tpu_info()
        vmem_cap = int(getattr(info, "vmem_capacity_bytes", vmem_cap))
    except Exception:
        pass
    return vmem_cap, num_tc, gen


# --------------------------------------------------------------------------- kernels

def _ffn_kernel_acc(x_ref, w13_ref, w2_ref, o_ref, acc_ref):
    # x_ref:   (tm, dim)        token tile (resident across the hidden axis)
    # w13_ref: (dim, 2*th)      contiguous [w1^T tile | w3^T tile] for hidden tile h
    # w2_ref:  (th, dim)        w2^T row-tile for hidden tile h
    # o_ref:   (tm, dim)        output tile (written on the last hidden step)
    # acc_ref: (tm, dim) f32    accumulator scratch
    h = pl.program_id(1)
    th = w2_ref.shape[0]

    @pl.when(h == 0)
    def _init():
        acc_ref[...] = jnp.zeros_like(acc_ref)

    # One fused MXU dot produces both the gate (w1) and value (w3) projections.
    h13 = jnp.dot(x_ref[...], w13_ref[...], preferred_element_type=jnp.float32)
    h1 = h13[:, :th]
    h3 = h13[:, th:]
    gated = (h1 * jax.nn.sigmoid(h1)) * h3  # SiLU gating in f32

    acc_ref[...] += jnp.dot(gated.astype(w2_ref.dtype), w2_ref[...],
                            preferred_element_type=jnp.float32)

    @pl.when(h == pl.num_programs(1) - 1)
    def _finalize():
        o_ref[...] = acc_ref[...].astype(o_ref.dtype)


def _ffn_kernel_single(x_ref, w13_ref, w2_ref, o_ref):
    # nh == 1: whole hidden dim in one slab -> no accumulator, write output directly.
    th = w2_ref.shape[0]
    h13 = jnp.dot(x_ref[...], w13_ref[...], preferred_element_type=jnp.float32)
    h1 = h13[:, :th]
    h3 = h13[:, th:]
    gated = (h1 * jax.nn.sigmoid(h1)) * h3
    o_ref[...] = jnp.dot(gated.astype(w2_ref.dtype), w2_ref[...],
                         preferred_element_type=jnp.float32).astype(o_ref.dtype)


# ------------------------------------------------------------------- weight packing

def pick_hidden_tile(hidden: int, gen: str | None = None) -> int:
    """Pick a hidden tile width th (must divide hidden). Prefer 256-multiples for the
    2x256x256 MXUs of v6e/v7x; allow 1024 on 128-MiB-VMEM parts to halve step count."""
    if gen is None:
        gen = _tpu_config()[2]
    if gen == "v7x":
        cands = (512, 256, 384, 128, 64)          # keep slabs small on 64 MiB VMEM
    else:
        cands = (512, 1024, 256, 384, 128, 64)
    for c in cands:
        if c <= hidden and hidden % c == 0:
            return c
    return hidden


def pack_ffn_weights(w1, w2, w3, th: int | None = None, gen: str | None = None):
    """Pack PyTorch-layout weights into the kernel layout.

    Call this ONCE at model init and reuse the packed arrays every forward call.

    w1, w3: (hidden, dim); w2: (dim, hidden)   (nn.Linear (out, in) layout)
    Returns:
      w13: (nh, dim, 2*th)  hidden-tile-major; slab h = [w1^T tile h | w3^T tile h],
           so each grid step DMAs one contiguous HBM region.
      w2t: (hidden, dim)    w2^T; row tiles of th rows are already contiguous.
      th:  the hidden tile width used for packing.
    """
    hidden, dim = w1.shape
    assert w3.shape == (hidden, dim) and w2.shape == (dim, hidden)
    if th is None:
        th = pick_hidden_tile(hidden, gen)
    th = min(th, hidden)
    assert hidden % th == 0, "hidden_dim must be divisible by the hidden tile th"
    nh = hidden // th
    w1b = jnp.transpose(w1).reshape(dim, nh, th)
    w3b = jnp.transpose(w3).reshape(dim, nh, th)
    w13 = jnp.transpose(jnp.concatenate([w1b, w3b], axis=-1), (1, 0, 2))  # (nh, dim, 2*th)
    w2t = jnp.transpose(w2)                                               # (hidden, dim)
    return w13, w2t, th


# ------------------------------------------------------------------------ entry point

def feed_forward_packed(x, w13, w2t, *, tm: int | None = None):
    """SwiGLU FFN on pre-packed weights (hot path).

    x:   [..., dim]
    w13: (nh, dim, 2*th)  from pack_ffn_weights
    w2t: (hidden, dim)    from pack_ffn_weights
    """
    orig_shape = x.shape
    dim = orig_shape[-1]
    nh, dim_w, th2 = w13.shape
    th = th2 // 2
    hidden = nh * th
    assert dim_w == dim and w2t.shape == (hidden, dim)

    vmem_cap, num_tc, gen = _tpu_config()
    if gen == "v7x" or vmem_cap <= (64 << 20):
        vmem_ceiling = 56 << 20          # leave headroom under v7x's 64 MiB per TC
    else:
        vmem_ceiling = 100 << 20         # use most of v5e/v6e's 128 MiB

    if tm is None:
        # Roofline knees: v6e ~680 flops/byte, v7x ~310, v5e ~240 -> token tile sizes.
        tm = {"v6e": 768, "v7x": 512, "v5e": 256}.get(gen, 512)

    xf = x.reshape(-1, dim)
    n = xf.shape[0]
    q = _sublane_quantum(x.dtype)
    n_q = _round_up(n, q)
    tm_eff = max(q, min(_round_up(tm, q), n_q))
    # 2-TC chips: make sure the "parallel" token axis has >= 2 tiles when possible.
    if num_tc >= 2 and n_q >= 2 * q:
        tm_eff = min(tm_eff, _round_up((n_q + 1) // 2, q))

    in_isz = jnp.dtype(x.dtype).itemsize
    w_isz = jnp.dtype(w13.dtype).itemsize
    use_single_out_buf = (gen == "v7x") and hasattr(pl, "Buffered")
    out_bufs = 1 if use_single_out_buf else 2

    def tile_bytes(t):
        acc = 0 if nh == 1 else t * dim * 4
        return (2 * t * dim * in_isz              # x tiles (double-buffered)
                + 2 * dim * 2 * th * w_isz        # w13 slabs (double-buffered)
                + 2 * th * dim * w_isz            # w2t slabs (double-buffered)
                + out_bufs * t * dim * in_isz     # output tiles
                + acc                             # f32 accumulator
                + t * 2 * th * 4                  # h13 f32 intermediate
                + t * th * 4)                     # gated f32 intermediate

    # Shrink the token tile until the double-buffered working set fits this chip.
    while tile_bytes(tm_eff) > int(vmem_ceiling * 0.9) and tm_eff > q:
        tm_eff = max(q, _round_up(tm_eff // 2, q))

    n_pad = _round_up(n, tm_eff)
    if n_pad != n:
        xf = jnp.pad(xf, ((0, n_pad - n), (0, 0)))

    grid = (n_pad // tm_eff, nh)
    vmem_limit = int(min(max(int(tile_bytes(tm_eff) * 1.2), 32 << 20), vmem_ceiling))

    out_spec = pl.BlockSpec((tm_eff, dim), lambda i, h: (i, 0))
    if use_single_out_buf:
        # Output is written once per token tile -> single buffering frees tm*dim*isz.
        try:
            out_spec = pl.BlockSpec((tm_eff, dim), lambda i, h: (i, 0),
                                    pipeline_mode=pl.Buffered(1))
        except Exception:
            out_spec = pl.BlockSpec((tm_eff, dim), lambda i, h: (i, 0))

    in_specs = [
        pl.BlockSpec((tm_eff, dim), lambda i, h: (i, 0)),            # x tile
        pl.BlockSpec((None, dim, 2 * th), lambda i, h: (h, 0, 0)),   # contiguous w13 slab
        pl.BlockSpec((th, dim), lambda i, h: (h, 0)),                # w2t row slab
    ]

    if nh == 1:
        kernel = _ffn_kernel_single
        scratch = []
    else:
        kernel = _ffn_kernel_acc
        scratch = [pltpu.VMEM((tm_eff, dim), jnp.float32)]

    out = pl.pallas_call(
        kernel,
        out_shape=jax.ShapeDtypeStruct((n_pad, dim), x.dtype),
        grid_spec=pltpu.PrefetchScalarGridSpec(
            num_scalar_prefetch=0,
            grid=grid,
            in_specs=in_specs,
            out_specs=out_spec,
            scratch_shapes=scratch,
        ),
        compiler_params=pltpu.CompilerParams(
            dimension_semantics=("parallel", "arbitrary"),
            vmem_limit_bytes=vmem_limit,
        ),
    )(xf, w13, w2t)

    if n_pad != n:
        out = out[:n]
    return out.reshape(orig_shape)


def feed_forward(x, w1, w2, w3, *, tm=None, th=None):
    """Convenience wrapper matching the PyTorch module signature.
    NOTE: this re-packs the weights every call; in a real model call
    pack_ffn_weights() once at init and use feed_forward_packed()."""
    w13, w2t, _ = pack_ffn_weights(w1, w2, w3, th=th)
    return feed_forward_packed(x, w13, w2t, tm=tm)


def feed_forward_ref(x, w1, w2, w3):
    h1 = x @ w1.T
    h3 = x @ w3.T
    return ((h1 * jax.nn.sigmoid(h1)) * h3) @ w2.T


# ----------------------------------------------------------------------------- tests

if __name__ == "__main__":
    key = jax.random.PRNGKey(0)

    # --- Test 1: toy shapes, nh == 1 path (no accumulator scratch), pack-once reuse ---
    batch, seq, dim, hidden = 2, 8, 32, 64
    kx, k1, k2, k3, key = jax.random.split(key, 5)
    x = jax.random.normal(kx, (batch, seq, dim), dtype=jnp.float32)
    w1 = jax.random.normal(k1, (hidden, dim), dtype=jnp.float32) * 0.05
    w2 = jax.random.normal(k2, (dim, hidden), dtype=jnp.float32) * 0.05
    w3 = jax.random.normal(k3, (hidden, dim), dtype=jnp.float32) * 0.05

    w13, w2t, _ = pack_ffn_weights(w1, w2, w3)          # hoisted packing (init-time)
    y = jax.block_until_ready(feed_forward_packed(x, w13, w2t))
    y_ref = feed_forward_ref(x, w1, w2, w3)
    assert y.shape == x.shape
    assert jnp.allclose(y, y_ref, atol=1e-4, rtol=1e-4), "mismatch vs reference (test 1)"

    # Re-use the same packed weights on a second call (different token count).
    x1b = jax.random.normal(key, (3, 5, dim), dtype=jnp.float32)
    y1b = jax.block_until_ready(feed_forward_packed(x1b, w13, w2t))
    assert jnp.allclose(y1b, feed_forward_ref(x1b, w1, w2, w3), atol=1e-4, rtol=1e-4), \
        "mismatch vs reference (test 1b)"

    # --- Test 2: token padding, multiple token tiles and hidden-axis accumulation ---
    batch2, seq2, dim2, hidden2 = 2, 40, 128, 384
    kx, k1, k2, k3, key = jax.random.split(key, 5)
    x2 = jax.random.normal(kx, (batch2, seq2, dim2), dtype=jnp.float32)
    w1b = jax.random.normal(k1, (hidden2, dim2), dtype=jnp.float32) * 0.05
    w2b = jax.random.normal(k2, (dim2, hidden2), dtype=jnp.float32) * 0.05
    w3b = jax.random.normal(k3, (hidden2, dim2), dtype=jnp.float32) * 0.05

    y2 = jax.block_until_ready(feed_forward(x2, w1b, w2b, w3b, tm=32, th=128))
    y2_ref = feed_forward_ref(x2, w1b, w2b, w3b)
    assert y2.shape == x2.shape
    assert jnp.allclose(y2, y2_ref, atol=1e-4, rtol=1e-4), "mismatch vs reference (test 2)"

    # --- Test 3: bf16 inputs/weights (exercises 16-row sublane quantum & dtype casts) ---
    batch3, seq3, dim3, hidden3 = 2, 12, 128, 256
    kx, k1, k2, k3, key = jax.random.split(key, 5)
    x3 = (jax.random.normal(kx, (batch3, seq3, dim3)) ).astype(jnp.bfloat16)
    w1c = (jax.random.normal(k1, (hidden3, dim3)) * 0.05).astype(jnp.bfloat16)
    w2c = (jax.random.normal(k2, (dim3, hidden3)) * 0.05).astype(jnp.bfloat16)
    w3c = (jax.random.normal(k3, (hidden3, dim3)) * 0.05).astype(jnp.bfloat16)

    y3 = jax.block_until_ready(feed_forward(x3, w1c, w2c, w3c))
    y3_ref = feed_forward_ref(x3.astype(jnp.float32), w1c.astype(jnp.float32),
                              w2c.astype(jnp.float32), w3c.astype(jnp.float32))
    assert y3.shape == x3.shape
    assert jnp.allclose(y3.astype(jnp.float32), y3_ref, atol=3e-2, rtol=5e-2), \
        "mismatch vs reference (test 3)"

    print("KERNEL_OK")
</pallas_src>

<mosaic_0001>
module attributes {stable_mosaic.version = 11 : i64} {
  func.func @_ffn_kernel_single(%arg0: i32, %arg1: i32, %arg2: memref<16x32xf32, #tpu.memory_space<vmem>>, %arg3: memref<1x32x128xf32, #tpu.memory_space<vmem>>, %arg4: memref<64x32xf32, #tpu.memory_space<vmem>>, %arg5: memref<16x32xf32, #tpu.memory_space<vmem>>) attributes {dimension_semantics = [#tpu.dimension_semantics<parallel>, #tpu.dimension_semantics<arbitrary>], iteration_bounds = array<i64: 1, 1>, scalar_prefetch = 0 : i64, scratch_operands = 0 : i64, tpu.core_type = #tpu.core_type<tc>, window_params = [{transform_indices = @transform_0, window_bounds = array<i64: 16, 32>}, {transform_indices = @transform_1, window_bounds = array<i64: 1, 32, 128>}, {transform_indices = @transform_2, window_bounds = array<i64: 64, 32>}, {transform_indices = @transform_3, window_bounds = array<i64: 16, 32>}]} {
    %c0 = arith.constant 0 : index
    %c0_0 = arith.constant 0 : index
    %0 = vector.load %arg2[%c0, %c0_0] : memref<16x32xf32, #tpu.memory_space<vmem>>, vector<16x32xf32>
    %c0_1 = arith.constant 0 : index
    %c0_2 = arith.constant 0 : index
    %c0_3 = arith.constant 0 : index
    %1 = vector.load %arg3[%c0_1, %c0_2, %c0_3] : memref<1x32x128xf32, #tpu.memory_space<vmem>>, vector<1x32x128xf32>
    %2 = vector.shape_cast %1 : vector<1x32x128xf32> to vector<32x128xf32>
    %cst = arith.constant dense<0.000000e+00> : vector<16x128xf32>
    %3 = tpu.matmul %0, %2, %cst {dimension_numbers = #tpu.dot_dimension_numbers<[1], [0], [0], [1], [0, 0, 1, 1], [], []>} : vector<16x32xf32>, vector<32x128xf32>, vector<16x128xf32> -> vector<16x128xf32>
    %4 = vector.extract_strided_slice %3 {offsets = [0, 0], sizes = [16, 64], strides = [1, 1]} : vector<16x128xf32> to vector<16x64xf32>
    %5 = vector.extract_strided_slice %3 {offsets = [0, 64], sizes = [16, 64], strides = [1, 1]} : vector<16x128xf32> to vector<16x64xf32>
    %6 = arith.negf %4 : vector<16x64xf32>
    %7 = math.exp %6 : vector<16x64xf32>
    %cst_4 = arith.constant 1.000000e+00 : f32
    %8 = vector.broadcast %cst_4 : f32 to vector<16x64xf32>
    %9 = arith.addf %8, %7 : vector<16x64xf32>
    %10 = arith.divf %8, %9 : vector<16x64xf32>
    %11 = arith.mulf %4, %10 : vector<16x64xf32>
    %12 = arith.mulf %11, %5 : vector<16x64xf32>
    %c0_5 = arith.constant 0 : index
    %c0_6 = arith.constant 0 : index
    %13 = vector.load %arg4[%c0_5, %c0_6] : memref<64x32xf32, #tpu.memory_space<vmem>>, vector<64x32xf32>
    %cst_7 = arith.constant dense<0.000000e+00> : vector<16x32xf32>
    %14 = tpu.matmul %12, %13, %cst_7 {dimension_numbers = #tpu.dot_dimension_numbers<[1], [0], [0], [1], [0, 0, 1, 1], [], []>} : vector<16x64xf32>, vector<64x32xf32>, vector<16x32xf32> -> vector<16x32xf32>
    %c0_8 = arith.constant 0 : index
    %c0_9 = arith.constant 0 : index
    %15 = vector.load %arg5[%c0_8, %c0_9] : memref<16x32xf32, #tpu.memory_space<vmem>>, vector<16x32xf32>
    tpu.vector_store %arg5[%c0_8, %c0_9], %14 {strides = array<i32>} : memref<16x32xf32, #tpu.memory_space<vmem>>, vector<16x32xf32>,
    return
  }
  func.func @transform_0(%arg0: i32, %arg1: i32) -> (i32, i32) {
    %c0_i32 = arith.constant 0 : i32
    %c0_i32_0 = arith.constant 0 : i32
    return %arg0, %c0_i32 : i32, i32
  }
  func.func @transform_1(%arg0: i32, %arg1: i32) -> (i32, i32, i32) {
    %c0_i32 = arith.constant 0 : i32
    %c0_i32_0 = arith.constant 0 : i32
    %c0_i32_1 = arith.constant 0 : i32
    return %arg1, %c0_i32, %c0_i32_0 : i32, i32, i32
  }
  func.func @transform_2(%arg0: i32, %arg1: i32) -> (i32, i32) {
    %c0_i32 = arith.constant 0 : i32
    %c0_i32_0 = arith.constant 0 : i32
    return %arg1, %c0_i32 : i32, i32
  }
  func.func @transform_3(%arg0: i32, %arg1: i32) -> (i32, i32) {
    %c0_i32 = arith.constant 0 : i32
    %c0_i32_0 = arith.constant 0 : i32
    return %arg0, %c0_i32 : i32, i32
  }
}

</mosaic_0001>

<bundles_post_ra>
// kernel: tpu_custom_call.1
= control target key start
LH: loop header
LB: loop body
LE: loop exit
PB: predicated region body
PF: predicated region fallthrough
CT: control target
= control target key end

     0   :  { %vm21_vm0 = vcmask 261120   ;;  %s394_s0 = inlined_call_operand.vmem [shape: f32[16,32], index: 0, kind: input, shape index: {}]   ;;  %s395_s1 = inlined_call_operand.vmem [shape: f32[1,32,128], index: 1, kind: input, shape index: {}]   ;;  %s396_s2 = inlined_call_operand.vmem [shape: f32[64,32], index: 2, kind: input, shape index: {}]   ;;  %s397_s3 = inlined_call_operand.hbm [shape: f32[16,32], index: 3, kind: output, shape index: {}]  }
   0x1   :  { %v20_v0 = vld [vmem:[%s395_s1 + $0x18] sm:$0xff]  ;;  %v19_v1 = vld [vmem:[%s395_s1 + $0x10] sm:$0xff]  ;;  %v15_v2 = vld [vmem:[%s394_s0] sm:$0xff] }
   0x2   :  { %257 = vmatprep.subr.mxu0 %v20_v0  ;;  %v18_v3 = vld [vmem:[%s395_s1 + $0x8] sm:$0xff]  ;;  %265 = vmatprep.mubr.msk.f32.mxu0 %vm21_vm0, %v15_v2 }
   0x3   :  { %258 = vmatpush3.msra.mxu0 %v20_v0 }
   0x4   :  { %8 = vsyncpa [#allocation3], 0  ;;  %259 = vmatprep.subr.mxu0 %v19_v1  ;;  %v17_v4 = vld [vmem:[%s395_s1] sm:$0xff]  ;;  %v16_v5 = vld [vmem:[%s394_s0 + $0x8] sm:$0xff]  ;;  %s321_s11 = smov 64   ;;  %vm135_vm1 = vcmask 523264  }
   0x5   :  { %260 = vmatpush3.msra.mxu0 %v19_v1  ;;  %v134_v6 = vld [vmem:[%s396_s2 + $0x38] sm:$0xff]  ;;  %v133_v7 = vld [vmem:[%s396_s2 + $0x30] sm:$0xff]  ;;  %v132_v8 = vld [vmem:[%s396_s2 + $0x28] sm:$0xff] }
   0x6   :  { %261 = vmatprep.subr.mxu0 %v18_v3  ;;  %268 = vmatprep.subr.mxu1 %v134_v6  ;;  %v131_v9 = vld [vmem:[%s396_s2 + $0x20] sm:$0xff]  ;;  %v130_v10 = vld [vmem:[%s396_s2 + $0x18] sm:$0xff]  ;;  %v129_v11 = vld [vmem:[%s396_s2 + $0x10] sm:$0xff] }
   0x7   :  { %262 = vmatpush3.msra.mxu0 %v18_v3  ;;  %269 = vmatpush3.msra.mxu1 %v134_v6  ;;  %v128_v12 = vld [vmem:[%s396_s2 + $0x8] sm:$0xff]  ;;  %v127_v13 = vld [vmem:[%s396_s2] sm:$0xff]  ;;  %s322_s2 = smov [#allocation2]  }
   0x8   :  { %263 = vmatprep.subr.mxu0 %v17_v4  ;;  %270 = vmatprep.subr.mxu1 %v133_v7  ;;  %s224_s12 = sshll.u32 %s322_s2, 4  ;;  %s225_s12 = int_to_ptr.vmem [resolvable:$true] %s224_s12 }
   0x9   :  { %264 = vmatpush3.msra.mxu0 %v17_v4  ;;  %271 = vmatpush3.msra.mxu1 %v133_v7  ;;  %s299_s13 = scalar_lea.vmem %s225_s12, 256  ;;  %p304_p1 = scmp.lt.s32.totalorder %s225_s12, %s225_s12 }
   0xa   :  { %266 = vmatmul.mubr.msk.f32.vlgmr.msra.gmra.mxu0 %vm21_vm0, %v16_v5  ;;  %272 = vmatprep.subr.mxu1 %v132_v8  ;;  %p300_p0 = scmp.ne.s32.totalorder %s225_s12, %s299_s13  ;;  %p305_p2 = scmp.lt.s32.totalorder %s299_s13, %s299_s13 }
   0xb   :  { %273 = vmatpush3.msra.mxu1 %v132_v8 }
   0xc   :  { %274 = vmatprep.subr.mxu1 %v131_v9  ;;  %p306_p3 = por %p305_p2, %p304_p1 }
   0xd   :  { %275 = vmatpush3.msra.mxu1 %v131_v9 }
   0xe   :  { %276 = vmatprep.subr.mxu1 %v130_v10  ;;  %p307_p4 = pnand %p306_p3, %p300_p0 }
   0xf   :  { %277 = vmatpush3.msra.mxu1 %v130_v10 }
  0x10   :  { %278 = vmatprep.subr.mxu1 %v129_v11 }
  0x11   :  { %279 = vmatpush3.msra.mxu1 %v129_v11 }
  0x12   :  { %280 = vmatprep.subr.mxu1 %v128_v12 }
  0x13   :  { %281 = vmatpush3.msra.mxu1 %v128_v12 }
  0x14   :  { %282 = vmatprep.subr.mxu1 %v127_v13 }
  0x15   :  { %283 = vmatpush3.msra.mxu1 %v127_v13 }
  0xca   :  { %v267_v14 = vpop.f32.mrf.mxu0 }
  0xcb   :  { %v238_v17 = vmul.f32 -1.442695, %v267_v14 }
  0xcc   :  { %v94_v15 = vpop.f32.mrf.mxu0 }
  0xcd   :  { %119 = vrot.lane.b32.xlu0 %v94_v15, %s321_s11  ;;  %v237_v16 = vmul.f32 -1.442695, %v94_v15 }
  0xcf   :  { %291 = vpow2.f32 %v237_v16 }
  0xd0   :  { %293 = vpow2.f32 %v238_v17 }
  0xd1   :  { %121 = vrot.lane.b32.xlu0 %v267_v14, %s321_s11 }
  0xdc   :  { %v292_v18 = vpop.eup %291 }
  0xdd   :  { %v109_v19 = vadd.f32 1.0, %v292_v18  ;;  %v294_v20 = vpop.eup %293 }
  0xde   :  { %v110_v21 = vadd.f32 1.0, %v294_v20 }
  0xdf   :  { %295 = vrcp.f32 %v109_v19 }
  0xe0   :  { %297 = vrcp.f32 %v110_v21 }
  0xec   :  { %v296_v22 = vpop.eup %295 }
  0xed   :  { %v115_v23 = vmul.f32 %v296_v22, %v94_v15  ;;  %v298_v24 = vpop.eup %297 }
  0xee   :  { %v116_v27 = vmul.f32 %v298_v24, %v267_v14 }
 0x13f   :  { %v120_v25 = vpop.permute.xlu0 %119 }
 0x140   :  { %v125_v26 = vmul.f32 %v120_v25, %v115_v23 }
 0x142   :  { %284 = vmatprep.mubr.msk.f32.mxu1 %vm135_vm1, %v125_v26 }
 0x143   :  { %v122_v28 = vpop.permute.xlu0 %121 }
 0x144   :  { %v126_v29 = vmul.f32 %v122_v28, %v116_v27 }
 0x146   :  { %285 = vmatmul.mubr.msk.f32.vlgmr.msra.gmra.mxu1 %vm135_vm1, %v126_v29 }
 0x206   :  { %v286_v30 = vpop.f32.mrf.mxu1 }
 0x207   :  { %218 = vst.msk [vmem:[#allocation2 + $0x8] sm:$0xff] %vm21_vm0, %v286_v30 }
 0x208   :  { %v208_v31 = vpop.f32.mrf.mxu1 }
 0x209   :  { %217 = vst.msk [vmem:[#allocation2] sm:$0xff] %vm21_vm0, %v208_v31 }
 0x20a   :  { %310 = shalt.err (!%p307_p4)
}
 0x20b   :  { %s323_s14 = smov 128   ;;  %s324_s15 = smov 8  }
 0x20c   :  { %230 = dma.vmem_to_hbm [thread:$0]  %s225_s12, 256, %s397_s3, [#allocation3], %s323_s14, %s323_s14, %s324_s15  }
 0x20d   :  { %319 = dma.done.wait [#allocation3], 256  }
 0x20e   :  { %320 = vsyncadd [#allocation3], 4294967040 }
 0x20f   :  { %234 = vsyncpa [#allocation3], 1 }

</bundles_post_ra>
